<compile_context>
chip_gen: v7x
topology: tpu7x:2x2x1
jax: 0.10.0
libtpu: 0.0.40
codegen_flags: <defaults>
</compile_context>

<pallas_src>
import functools

import jax
import jax.numpy as jnp
from jax import lax
from jax.experimental import pallas as pl
from jax.experimental.pallas import tpu as pltpu

BN_EPS = 1e-5
NEG_BIG = -1e30


def _vmem_spec():
    return pl.BlockSpec(memory_space=pltpu.MemorySpace.VMEM)


def _pad128(n):
    return ((n + 127) // 128) * 128


# ---------------------------------------------------------------------------
# Kernel A: conv1 + MaxPool2d(3) + BatchNorm2d(eval) + ReLU (single VMEM block)
# ---------------------------------------------------------------------------
def _conv1_pool_bn_relu_kernel(p_ref, w_ref, b_ref, scale_ref, shift_ref, o_ref,
                               *, n_taps):
    # p_ref: [n_taps * Mp, K] bf16 (pool-tap outermost), w_ref: [K, 64] bf16
    c = jnp.dot(p_ref[...], w_ref[...], preferred_element_type=jnp.float32)
    c = c + b_ref[...]
    mp = o_ref.shape[0]
    m = c[0:mp, :]
    for t in range(1, n_taps):
        m = jnp.maximum(m, c[t * mp:(t + 1) * mp, :])
    # eval-mode BatchNorm2d affine + ReLU
    o_ref[...] = jnp.maximum(m * scale_ref[...] + shift_ref[...], 0.0)


def conv1_pool_bn_relu(patches, w, b, scale, shift, mp):
    return pl.pallas_call(
        functools.partial(_conv1_pool_bn_relu_kernel,
                          n_taps=patches.shape[0] // mp),
        out_shape=jax.ShapeDtypeStruct((mp, w.shape[1]), jnp.float32),
        in_specs=[_vmem_spec()] * 5,
        out_specs=_vmem_spec(),
    )(patches, w, b, scale, shift)


# ---------------------------------------------------------------------------
# Fallback conv2 kernel (only used if H2*W2 > 1): matmul + bias + ReLU
# ---------------------------------------------------------------------------
def _matmul_bias_relu_kernel(x_ref, w_ref, b_ref, o_ref):
    y = jnp.dot(x_ref[...], w_ref[...], preferred_element_type=jnp.float32)
    o_ref[...] = jnp.maximum(y + b_ref[...], 0.0)


def matmul_bias_relu(x, w, b):
    return pl.pallas_call(
        _matmul_bias_relu_kernel,
        out_shape=jax.ShapeDtypeStruct((x.shape[0], w.shape[1]), jnp.float32),
        in_specs=[_vmem_spec()] * 3,
        out_specs=_vmem_spec(),
    )(x, w, b)


# ---------------------------------------------------------------------------
# Kernel B: fused MLP tail (conv2 + fc + hidden blocks + z head + softmax y head)
# ---------------------------------------------------------------------------
def _mlp_kernel(*refs, n_hidden, fuse_conv2):
    it = iter(refs)
    x_ref = next(it)
    if fuse_conv2:
        c2w_ref, c2b_ref = next(it), next(it)
    fcw_ref, fcb_ref = next(it), next(it)
    hid = [(next(it), next(it)) for _ in range(n_hidden)]
    zw_ref, zb_ref, yw_ref, yb_ref = next(it), next(it), next(it), next(it)
    z_ref, y_ref = next(it), next(it)

    h = x_ref[...]                                              # bf16 activations
    if fuse_conv2:
        h = jnp.dot(h, c2w_ref[...], preferred_element_type=jnp.float32)
        h = jnp.maximum(h + c2b_ref[...], 0.0).astype(jnp.bfloat16)
    # fc + ReLU (its BatchNorm1d is folded into the next weights)
    h = jnp.dot(h, fcw_ref[...], preferred_element_type=jnp.float32) + fcb_ref[...]
    h = jnp.maximum(h, 0.0)
    # hidden blocks (previous BN folded into each W/b)
    for w_ref, b_ref in hid:
        h = jnp.dot(h.astype(jnp.bfloat16), w_ref[...],
                    preferred_element_type=jnp.float32) + b_ref[...]
        h = jnp.maximum(h, 0.0)
    hb = h.astype(jnp.bfloat16)
    # z head (BN_prev and BN_z folded into zw/zb), lane-dense 128-padded output
    z_ref[...] = jnp.dot(hb, zw_ref[...],
                         preferred_element_type=jnp.float32) + zb_ref[...]
    # y head: padded logits carry a -1e30 bias so softmax over 128 lanes is exact
    logits = jnp.dot(hb, yw_ref[...],
                     preferred_element_type=jnp.float32) + yb_ref[...]
    m = jnp.max(logits, axis=-1, keepdims=True)
    e = jnp.exp(logits - m)
    y_ref[...] = e / jnp.sum(e, axis=-1, keepdims=True)


def mlp_fused(x, prep, *, fuse_conv2, latent_dim, n_classes):
    B = x.shape[0]
    args = [x]
    if fuse_conv2:
        args += [prep['conv2_w'], prep['conv2_b']]
    args += [prep['fc_w'], prep['fc_b']]
    for w, b in prep['hidden']:
        args += [w, b]
    args += [prep['z_w'], prep['z_b'], prep['y_w'], prep['y_b']]
    z_pad, y_pad = pl.pallas_call(
        functools.partial(_mlp_kernel, n_hidden=len(prep['hidden']),
                          fuse_conv2=fuse_conv2),
        out_shape=(jax.ShapeDtypeStruct((B, prep['z_w'].shape[1]), jnp.float32),
                   jax.ShapeDtypeStruct((B, prep['y_w'].shape[1]), jnp.float32)),
        in_specs=[_vmem_spec() for _ in args],
        out_specs=(_vmem_spec(), _vmem_spec()),
    )(*args)
    return z_pad[:, :latent_dim], y_pad[:, :n_classes]


# ----------------------------- JAX glue --------------------------------------
def conv1_pool_patches(x_nhwc, Hp, Wp):
    """im2col patches for Conv2d(Cin,64,3,stride=2), restricted to the conv
    positions consumed by MaxPool2d(3), ordered pool-tap-major:
    row = tap*(B*Hp*Wp) + b*Hp*Wp + hp*Wp + wp with tap = dh*3 + dw.
    Columns are (kh, kw, cin), matching conv1_w.reshape(9*Cin, 64)."""
    taps = []
    for dh in range(3):
        for dw in range(3):
            cols = []
            for kh in range(3):
                for kw in range(3):
                    r0 = 2 * dh + kh
                    c0 = 2 * dw + kw
                    cols.append(x_nhwc[:, r0:r0 + 6 * Hp:6, c0:c0 + 6 * Wp:6, :])
            taps.append(jnp.concatenate(cols, axis=-1))          # [B,Hp,Wp,9*Cin]
    p = jnp.stack(taps, axis=0)                                  # [9,B,Hp,Wp,9*Cin]
    return p.reshape(-1, p.shape[-1])


def im2col(x_nhwc, ksize, stride):
    """Patch extraction with (kh, kw, cin) column ordering."""
    B, H, W, C = x_nhwc.shape
    Ho = (H - ksize) // stride + 1
    Wo = (W - ksize) // stride + 1
    taps = []
    for kh in range(ksize):
        for kw in range(ksize):
            taps.append(x_nhwc[:, kh:kh + stride * Ho:stride,
                               kw:kw + stride * Wo:stride, :])
    patches = jnp.stack(taps, axis=3).reshape(B * Ho * Wo, ksize * ksize * C)
    return patches, Ho, Wo


def init_params(key, input_dim, hidden_dim, latent_dim, n_classes, n_layers):
    keys = iter(jax.random.split(key, 16 + 4 * n_layers))

    def nrm(shape, s=0.05):
        return s * jax.random.normal(next(keys), shape, dtype=jnp.float32)

    p = {}
    # NOTE: conv weights are stored (KH, KW, Cin, Cout). Real PyTorch weights
    # (Cout, Cin, KH, KW) must be permuted with transpose(2, 3, 1, 0) when loading.
    p['conv1_w'] = nrm((3, 3, 3, 64))
    p['conv1_b'] = nrm((64,))
    p['bn2d_gamma'] = 1.0 + nrm((64,))
    p['bn2d_beta'] = nrm((64,))
    p['conv2_w'] = nrm((3, 3, 64, 128))
    p['conv2_b'] = nrm((128,))
    p['fc_w'] = nrm((input_dim, hidden_dim))
    p['fc_b'] = nrm((hidden_dim,))
    p['bn_in_gamma'] = 1.0 + nrm((hidden_dim,))
    p['bn_in_beta'] = nrm((hidden_dim,))
    p['hidden'] = []
    for _ in range(n_layers):
        p['hidden'].append(dict(
            w=nrm((hidden_dim, hidden_dim)),
            b=nrm((hidden_dim,)),
            gamma=1.0 + nrm((hidden_dim,)),
            beta=nrm((hidden_dim,)),
        ))
    p['bn_z_gamma'] = 1.0 + nrm((hidden_dim,))
    p['bn_z_beta'] = nrm((hidden_dim,))
    p['z_w'] = nrm((hidden_dim, latent_dim))
    p['z_b'] = nrm((latent_dim,))
    p['y_w'] = nrm((hidden_dim, n_classes))
    p['y_b'] = nrm((n_classes,))
    return p


def prepare_params(p, H2, W2):
    """One-time weight prep: reshape conv weights, permute fc rows to NHWC-flatten
    order, fold every eval-mode BatchNorm1d affine into downstream weights,
    lane-pad the z/y heads to 128 and cast matmul weights to bf16."""
    hidden = p['fc_w'].shape[1]
    latent = p['z_w'].shape[1]
    ncls = p['y_w'].shape[1]

    def bn_scale(gamma):
        # eval mode, running stats mean=0 / var=1
        return gamma / jnp.sqrt(1.0 + BN_EPS)

    q = {}
    q['conv1_w'] = p['conv1_w'].reshape(-1, 64).astype(jnp.bfloat16)
    q['conv1_b'] = p['conv1_b'].reshape(1, 64).astype(jnp.float32)
    q['bn2d_scale'] = bn_scale(p['bn2d_gamma']).reshape(1, 64).astype(jnp.float32)
    q['bn2d_shift'] = p['bn2d_beta'].reshape(1, 64).astype(jnp.float32)

    q['conv2_w'] = p['conv2_w'].reshape(-1, 128).astype(jnp.bfloat16)
    q['conv2_b'] = p['conv2_b'].reshape(1, 128).astype(jnp.float32)

    # fc: permute rows from PyTorch NCHW-flatten (c,h,w) to NHWC-flatten (h,w,c).
    # Identity when H2 = W2 = 1.
    fc_w = p['fc_w'].reshape(128, H2, W2, hidden).transpose(1, 2, 0, 3)
    fc_w = fc_w.reshape(128 * H2 * W2, hidden)
    q['fc_w'] = fc_w.astype(jnp.bfloat16)
    q['fc_b'] = p['fc_b'].reshape(1, hidden).astype(jnp.float32)

    # Fold BN1d (scale, shift) of each Linear+ReLU+BN block into the NEXT layer.
    sc, sh = bn_scale(p['bn_in_gamma']), p['bn_in_beta']
    q['hidden'] = []
    for blk in p['hidden']:
        w = blk['w'] * sc[:, None]
        b = blk['b'] + sh @ blk['w']
        q['hidden'].append((w.astype(jnp.bfloat16),
                            b.reshape(1, hidden).astype(jnp.float32)))
        sc, sh = bn_scale(blk['gamma']), blk['beta']

    # z head: compose the trailing BN with BN_z, fold into z_w / z_b.
    sz, tz = bn_scale(p['bn_z_gamma']), p['bn_z_beta']
    sc_z = sz * sc
    sh_z = sz * sh + tz
    z_w = p['z_w'] * sc_z[:, None]
    z_b = p['z_b'] + sh_z @ p['z_w']
    # y head: fold the trailing BN into y_w / y_b.
    y_w = p['y_w'] * sc[:, None]
    y_b = p['y_b'] + sh @ p['y_w']

    # Lane-dense 128-padded output heads.
    zp, yp = _pad128(latent), _pad128(ncls)
    z_w_pad = jnp.zeros((hidden, zp), jnp.float32).at[:, :latent].set(z_w)
    z_b_pad = jnp.zeros((1, zp), jnp.float32).at[0, :latent].set(z_b)
    y_w_pad = jnp.zeros((hidden, yp), jnp.float32).at[:, :ncls].set(y_w)
    y_b_pad = jnp.full((1, yp), NEG_BIG, jnp.float32).at[0, :ncls].set(y_b)
    q['z_w'] = z_w_pad.astype(jnp.bfloat16)
    q['z_b'] = z_b_pad
    q['y_w'] = y_w_pad.astype(jnp.bfloat16)
    q['y_b'] = y_b_pad
    return q


def encoder_forward(x_nchw, prep, *, latent_dim, n_classes):
    B, _, H, W = x_nchw.shape
    x = jnp.transpose(x_nchw, (0, 2, 3, 1)).astype(jnp.float32)   # NCHW -> NHWC

    H1 = (H - 3) // 2 + 1
    W1 = (W - 3) // 2 + 1
    Hp = (H1 - 3) // 3 + 1
    Wp = (W1 - 3) // 3 + 1
    Mp = B * Hp * Wp

    # Kernel A: Conv2d(3,64,3,s=2) + MaxPool2d(3) + BatchNorm2d(eval) + ReLU
    p1 = conv1_pool_patches(x, Hp, Wp).astype(jnp.bfloat16)       # [9*Mp, 27]
    pooled = conv1_pool_bn_relu(p1, prep['conv1_w'], prep['conv1_b'],
                                prep['bn2d_scale'], prep['bn2d_shift'], Mp)
    pooled = pooled.reshape(B, Hp, Wp, 64)

    # conv2 im2col (tiny XLA glue between the two kernels)
    p2, H2, W2 = im2col(pooled, 3, 2)

    if H2 * W2 == 1:
        # Kernel B does conv2 + ReLU + fc + hidden + z + y in one launch
        # (NCHW flatten is a no-op for a 1x1 spatial output).
        x_mlp = p2.astype(jnp.bfloat16)                           # [B, 576]
        fuse_conv2 = True
    else:
        # TODO(synk): fold conv2 + NCHW-flatten into the fused MLP kernel for H2*W2 > 1 too.
        c2 = matmul_bias_relu(p2.astype(jnp.bfloat16),
                              prep['conv2_w'], prep['conv2_b'])   # [B*H2*W2, 128]
        # NHWC flatten; fc_w rows were permuted to match at prepare time.
        x_mlp = c2.reshape(B, H2 * W2 * 128).astype(jnp.bfloat16)
        fuse_conv2 = False

    return mlp_fused(x_mlp, prep, fuse_conv2=fuse_conv2,
                     latent_dim=latent_dim, n_classes=n_classes)


# ----------------------- pure-JAX reference (eval mode) -----------------------
def reference_forward(x_nchw, p):
    x = jnp.transpose(x_nchw, (0, 2, 3, 1)).astype(jnp.float32)
    dn = ('NHWC', 'HWIO', 'NHWC')
    c1 = lax.conv_general_dilated(x, p['conv1_w'], (2, 2), 'VALID',
                                  dimension_numbers=dn) + p['conv1_b']
    pooled = lax.reduce_window(c1, -jnp.inf, lax.max,
                               (1, 3, 3, 1), (1, 3, 3, 1), 'VALID')
    s1 = p['bn2d_gamma'] / jnp.sqrt(1.0 + BN_EPS)
    h = jnp.maximum(pooled * s1 + p['bn2d_beta'], 0.0)
    c2 = lax.conv_general_dilated(h, p['conv2_w'], (2, 2), 'VALID',
                                  dimension_numbers=dn) + p['conv2_b']
    c2 = jnp.maximum(c2, 0.0)
    feat = jnp.transpose(c2, (0, 3, 1, 2)).reshape(x.shape[0], -1)   # NCHW flatten

    def lin_relu_bn(v, w, b, g, beta):
        v = jnp.maximum(v @ w + b, 0.0)
        return v * (g / jnp.sqrt(1.0 + BN_EPS)) + beta

    hv = lin_relu_bn(feat, p['fc_w'], p['fc_b'], p['bn_in_gamma'], p['bn_in_beta'])
    for blk in p['hidden']:
        hv = lin_relu_bn(hv, blk['w'], blk['b'], blk['gamma'], blk['beta'])
    sz = p['bn_z_gamma'] / jnp.sqrt(1.0 + BN_EPS)
    z = (hv * sz + p['bn_z_beta']) @ p['z_w'] + p['z_b']
    y = jax.nn.softmax(hv @ p['y_w'] + p['y_b'], axis=-1)
    return z, y


if __name__ == "__main__":
    # Small shapes consistent with the module's conv stack.
    B, C, H, W = 2, 3, 27, 27
    hidden_dim, latent_dim, n_classes, n_layers = 32, 8, 10, 1

    # Derive input_dim exactly as the PyTorch conv_block would produce it.
    H1 = (H - 3) // 2 + 1            # conv1, stride 2        -> 13
    Hp = (H1 - 3) // 3 + 1           # maxpool 3              -> 4
    H2 = (Hp - 3) // 2 + 1           # conv2, stride 2        -> 1
    input_dim = 128 * H2 * H2        # 128

    key = jax.random.PRNGKey(0)
    kx, kp = jax.random.split(key)
    x = jax.random.normal(kx, (B, C, H, W), dtype=jnp.float32)
    params = init_params(kp, input_dim, hidden_dim, latent_dim, n_classes, n_layers)
    prep = prepare_params(params, H2, H2)          # one-time weight prep / BN folding

    fwd = jax.jit(functools.partial(encoder_forward,
                                    latent_dim=latent_dim, n_classes=n_classes))
    z, y = fwd(x, prep)
    jax.block_until_ready((z, y))

    assert z.shape == (B, latent_dim), z.shape
    assert y.shape == (B, n_classes), y.shape
    # softmax rows must sum to 1
    assert bool(jnp.all(jnp.abs(jnp.sum(y, axis=-1) - 1.0) < 1e-4))

    # Cross-check against a pure-JAX f32 reference (bf16 matmul tolerance).
    z_ref, y_ref = reference_forward(x, params)
    assert bool(jnp.allclose(z, z_ref, atol=5e-2, rtol=5e-2)), (z, z_ref)
    assert bool(jnp.allclose(y, y_ref, atol=2e-2, rtol=0.0)), (y, y_ref)
    print("KERNEL_OK")
</pallas_src>

<mosaic_0001>
module attributes {stable_mosaic.version = 11 : i64} {
  func.func @_conv1_pool_bn_relu_kernel(%arg0: memref<288x27xbf16, #tpu.memory_space<vmem>>, %arg1: memref<27x64xbf16, #tpu.memory_space<vmem>>, %arg2: memref<1x64xf32, #tpu.memory_space<vmem>>, %arg3: memref<1x64xf32, #tpu.memory_space<vmem>>, %arg4: memref<1x64xf32, #tpu.memory_space<vmem>>, %arg5: memref<32x64xf32, #tpu.memory_space<vmem>>) attributes {dimension_semantics = [], scalar_prefetch = 0 : i64, scratch_operands = 0 : i64, tpu.core_type = #tpu.core_type<tc>} {
    %c0 = arith.constant 0 : index
    %c0_0 = arith.constant 0 : index
    %0 = vector.load %arg0[%c0, %c0_0] : memref<288x27xbf16, #tpu.memory_space<vmem>>, vector<288x27xbf16>
    %c0_1 = arith.constant 0 : index
    %c0_2 = arith.constant 0 : index
    %1 = vector.load %arg1[%c0_1, %c0_2] : memref<27x64xbf16, #tpu.memory_space<vmem>>, vector<27x64xbf16>
    %cst = arith.constant dense<0.000000e+00> : vector<288x64xf32>
    %2 = tpu.matmul %0, %1, %cst {dimension_numbers = #tpu.dot_dimension_numbers<[1], [0], [0], [1], [0, 0, 1, 1], [], []>} : vector<288x27xbf16>, vector<27x64xbf16>, vector<288x64xf32> -> vector<288x64xf32>
    %c0_3 = arith.constant 0 : index
    %c0_4 = arith.constant 0 : index
    %3 = vector.load %arg2[%c0_3, %c0_4] : memref<1x64xf32, #tpu.memory_space<vmem>>, vector<1x64xf32>
    %4 = vector.broadcast %3 : vector<1x64xf32> to vector<288x64xf32>
    %5 = arith.addf %2, %4 : vector<288x64xf32>
    %6 = vector.extract_strided_slice %5 {offsets = [0, 0], sizes = [32, 64], strides = [1, 1]} : vector<288x64xf32> to vector<32x64xf32>
    %7 = vector.extract_strided_slice %5 {offsets = [32, 0], sizes = [32, 64], strides = [1, 1]} : vector<288x64xf32> to vector<32x64xf32>
    %8 = arith.maximumf %6, %7 : vector<32x64xf32>
    %9 = vector.extract_strided_slice %5 {offsets = [64, 0], sizes = [32, 64], strides = [1, 1]} : vector<288x64xf32> to vector<32x64xf32>
    %10 = arith.maximumf %8, %9 : vector<32x64xf32>
    %11 = vector.extract_strided_slice %5 {offsets = [96, 0], sizes = [32, 64], strides = [1, 1]} : vector<288x64xf32> to vector<32x64xf32>
    %12 = arith.maximumf %10, %11 : vector<32x64xf32>
    %13 = vector.extract_strided_slice %5 {offsets = [128, 0], sizes = [32, 64], strides = [1, 1]} : vector<288x64xf32> to vector<32x64xf32>
    %14 = arith.maximumf %12, %13 : vector<32x64xf32>
    %15 = vector.extract_strided_slice %5 {offsets = [160, 0], sizes = [32, 64], strides = [1, 1]} : vector<288x64xf32> to vector<32x64xf32>
    %16 = arith.maximumf %14, %15 : vector<32x64xf32>
    %17 = vector.extract_strided_slice %5 {offsets = [192, 0], sizes = [32, 64], strides = [1, 1]} : vector<288x64xf32> to vector<32x64xf32>
    %18 = arith.maximumf %16, %17 : vector<32x64xf32>
    %19 = vector.extract_strided_slice %5 {offsets = [224, 0], sizes = [32, 64], strides = [1, 1]} : vector<288x64xf32> to vector<32x64xf32>
    %20 = arith.maximumf %18, %19 : vector<32x64xf32>
    %21 = vector.extract_strided_slice %5 {offsets = [256, 0], sizes = [32, 64], strides = [1, 1]} : vector<288x64xf32> to vector<32x64xf32>
    %22 = arith.maximumf %20, %21 : vector<32x64xf32>
    %c0_5 = arith.constant 0 : index
    %c0_6 = arith.constant 0 : index
    %23 = vector.load %arg3[%c0_5, %c0_6] : memref<1x64xf32, #tpu.memory_space<vmem>>, vector<1x64xf32>
    %24 = vector.broadcast %23 : vector<1x64xf32> to vector<32x64xf32>
    %25 = arith.mulf %22, %24 : vector<32x64xf32>
    %c0_7 = arith.constant 0 : index
    %c0_8 = arith.constant 0 : index
    %26 = vector.load %arg4[%c0_7, %c0_8] : memref<1x64xf32, #tpu.memory_space<vmem>>, vector<1x64xf32>
    %27 = vector.broadcast %26 : vector<1x64xf32> to vector<32x64xf32>
    %28 = arith.addf %25, %27 : vector<32x64xf32>
    %cst_9 = arith.constant 0.000000e+00 : f32
    %29 = vector.broadcast %cst_9 : f32 to vector<32x64xf32>
    %30 = arith.maximumf %28, %29 : vector<32x64xf32>
    %c0_10 = arith.constant 0 : index
    %c0_11 = arith.constant 0 : index
    %31 = vector.load %arg5[%c0_10, %c0_11] : memref<32x64xf32, #tpu.memory_space<vmem>>, vector<32x64xf32>
    tpu.vector_store %arg5[%c0_10, %c0_11], %30 {strides = array<i32>} : memref<32x64xf32, #tpu.memory_space<vmem>>, vector<32x64xf32>,
    return
  }
}

module attributes {stable_mosaic.version = 11 : i64} {
  func.func @_mlp_kernel(%arg0: memref<2x576xbf16, #tpu.memory_space<vmem>>, %arg1: memref<576x128xbf16, #tpu.memory_space<vmem>>, %arg2: memref<1x128xf32, #tpu.memory_space<vmem>>, %arg3: memref<128x32xbf16, #tpu.memory_space<vmem>>, %arg4: memref<1x32xf32, #tpu.memory_space<vmem>>, %arg5: memref<32x32xbf16, #tpu.memory_space<vmem>>, %arg6: memref<1x32xf32, #tpu.memory_space<vmem>>, %arg7: memref<32x128xbf16, #tpu.memory_space<vmem>>, %arg8: memref<1x128xf32, #tpu.memory_space<vmem>>, %arg9: memref<32x128xbf16, #tpu.memory_space<vmem>>, %arg10: memref<1x128xf32, #tpu.memory_space<vmem>>, %arg11: memref<2x128xf32, #tpu.memory_space<vmem>>, %arg12: memref<2x128xf32, #tpu.memory_space<vmem>>) attributes {dimension_semantics = [], scalar_prefetch = 0 : i64, scratch_operands = 0 : i64, tpu.core_type = #tpu.core_type<tc>} {
    %c0 = arith.constant 0 : index
    %c0_0 = arith.constant 0 : index
    %0 = vector.load %arg0[%c0, %c0_0] : memref<2x576xbf16, #tpu.memory_space<vmem>>, vector<2x576xbf16>
    %c0_1 = arith.constant 0 : index
    %c0_2 = arith.constant 0 : index
    %1 = vector.load %arg1[%c0_1, %c0_2] : memref<576x128xbf16, #tpu.memory_space<vmem>>, vector<576x128xbf16>
    %cst = arith.constant dense<0.000000e+00> : vector<2x128xf32>
    %2 = tpu.matmul %0, %1, %cst {dimension_numbers = #tpu.dot_dimension_numbers<[1], [0], [0], [1], [0, 0, 1, 1], [], []>} : vector<2x576xbf16>, vector<576x128xbf16>, vector<2x128xf32> -> vector<2x128xf32>
    %c0_3 = arith.constant 0 : index
    %c0_4 = arith.constant 0 : index
    %3 = vector.load %arg2[%c0_3, %c0_4] : memref<1x128xf32, #tpu.memory_space<vmem>>, vector<1x128xf32>
    %4 = vector.broadcast %3 : vector<1x128xf32> to vector<2x128xf32>
    %5 = arith.addf %2, %4 : vector<2x128xf32>
    %cst_5 = arith.constant 0.000000e+00 : f32
    %6 = vector.broadcast %cst_5 : f32 to vector<2x128xf32>
    %7 = arith.maximumf %5, %6 : vector<2x128xf32>
    %8 = arith.truncf %7 : vector<2x128xf32> to vector<2x128xbf16>
    %c0_6 = arith.constant 0 : index
    %c0_7 = arith.constant 0 : index
    %9 = vector.load %arg3[%c0_6, %c0_7] : memref<128x32xbf16, #tpu.memory_space<vmem>>, vector<128x32xbf16>
    %cst_8 = arith.constant dense<0.000000e+00> : vector<2x32xf32>
    %10 = tpu.matmul %8, %9, %cst_8 {dimension_numbers = #tpu.dot_dimension_numbers<[1], [0], [0], [1], [0, 0, 1, 1], [], []>} : vector<2x128xbf16>, vector<128x32xbf16>, vector<2x32xf32> -> vector<2x32xf32>
    %c0_9 = arith.constant 0 : index
    %c0_10 = arith.constant 0 : index
    %11 = vector.load %arg4[%c0_9, %c0_10] : memref<1x32xf32, #tpu.memory_space<vmem>>, vector<1x32xf32>
    %12 = vector.broadcast %11 : vector<1x32xf32> to vector<2x32xf32>
    %13 = arith.addf %10, %12 : vector<2x32xf32>
    %cst_11 = arith.constant 0.000000e+00 : f32
    %14 = vector.broadcast %cst_11 : f32 to vector<2x32xf32>
    %15 = arith.maximumf %13, %14 : vector<2x32xf32>
    %16 = arith.truncf %15 : vector<2x32xf32> to vector<2x32xbf16>
    %c0_12 = arith.constant 0 : index
    %c0_13 = arith.constant 0 : index
    %17 = vector.load %arg5[%c0_12, %c0_13] : memref<32x32xbf16, #tpu.memory_space<vmem>>, vector<32x32xbf16>
    %cst_14 = arith.constant dense<0.000000e+00> : vector<2x32xf32>
    %18 = tpu.matmul %16, %17, %cst_14 {dimension_numbers = #tpu.dot_dimension_numbers<[1], [0], [0], [1], [0, 0, 1, 1], [], []>} : vector<2x32xbf16>, vector<32x32xbf16>, vector<2x32xf32> -> vector<2x32xf32>
    %c0_15 = arith.constant 0 : index
    %c0_16 = arith.constant 0 : index
    %19 = vector.load %arg6[%c0_15, %c0_16] : memref<1x32xf32, #tpu.memory_space<vmem>>, vector<1x32xf32>
    %20 = vector.broadcast %19 : vector<1x32xf32> to vector<2x32xf32>
    %21 = arith.addf %18, %20 : vector<2x32xf32>
    %cst_17 = arith.constant 0.000000e+00 : f32
    %22 = vector.broadcast %cst_17 : f32 to vector<2x32xf32>
    %23 = arith.maximumf %21, %22 : vector<2x32xf32>
    %24 = arith.truncf %23 : vector<2x32xf32> to vector<2x32xbf16>
    %c0_18 = arith.constant 0 : index
    %c0_19 = arith.constant 0 : index
    %25 = vector.load %arg7[%c0_18, %c0_19] : memref<32x128xbf16, #tpu.memory_space<vmem>>, vector<32x128xbf16>
    %cst_20 = arith.constant dense<0.000000e+00> : vector<2x128xf32>
    %26 = tpu.matmul %24, %25, %cst_20 {dimension_numbers = #tpu.dot_dimension_numbers<[1], [0], [0], [1], [0, 0, 1, 1], [], []>} : vector<2x32xbf16>, vector<32x128xbf16>, vector<2x128xf32> -> vector<2x128xf32>
    %c0_21 = arith.constant 0 : index
    %c0_22 = arith.constant 0 : index
    %27 = vector.load %arg8[%c0_21, %c0_22] : memref<1x128xf32, #tpu.memory_space<vmem>>, vector<1x128xf32>
    %28 = vector.broadcast %27 : vector<1x128xf32> to vector<2x128xf32>
    %29 = arith.addf %26, %28 : vector<2x128xf32>
    %c0_23 = arith.constant 0 : index
    %c0_24 = arith.constant 0 : index
    %30 = vector.load %arg11[%c0_23, %c0_24] : memref<2x128xf32, #tpu.memory_space<vmem>>, vector<2x128xf32>
    tpu.vector_store %arg11[%c0_23, %c0_24], %29 {strides = array<i32>} : memref<2x128xf32, #tpu.memory_space<vmem>>, vector<2x128xf32>,
    %c0_25 = arith.constant 0 : index
    %c0_26 = arith.constant 0 : index
    %31 = vector.load %arg9[%c0_25, %c0_26] : memref<32x128xbf16, #tpu.memory_space<vmem>>, vector<32x128xbf16>
    %cst_27 = arith.constant dense<0.000000e+00> : vector<2x128xf32>
    %32 = tpu.matmul %24, %31, %cst_27 {dimension_numbers = #tpu.dot_dimension_numbers<[1], [0], [0], [1], [0, 0, 1, 1], [], []>} : vector<2x32xbf16>, vector<32x128xbf16>, vector<2x128xf32> -> vector<2x128xf32>
    %c0_28 = arith.constant 0 : index
    %c0_29 = arith.constant 0 : index
    %33 = vector.load %arg10[%c0_28, %c0_29] : memref<1x128xf32, #tpu.memory_space<vmem>>, vector<1x128xf32>
    %34 = vector.broadcast %33 : vector<1x128xf32> to vector<2x128xf32>
    %35 = arith.addf %32, %34 : vector<2x128xf32>
    %cst_30 = arith.constant dense<0xFF800000> : vector<2xf32>
    %36 = vector.multi_reduction <maximumf>, %35, %cst_30 [1] : vector<2x128xf32> to vector<2xf32>
    %37 = vector.shape_cast %36 : vector<2xf32> to vector<2x1xf32>
    %38 = vector.broadcast %37 : vector<2x1xf32> to vector<2x128xf32>
    %39 = arith.subf %35, %38 : vector<2x128xf32>
    %40 = math.exp %39 : vector<2x128xf32>
    %cst_31 = arith.constant dense<0.000000e+00> : vector<2xf32>
    %41 = vector.multi_reduction <add>, %40, %cst_31 [1] : vector<2x128xf32> to vector<2xf32>
    %42 = vector.shape_cast %41 : vector<2xf32> to vector<2x1xf32>
    %43 = vector.broadcast %42 : vector<2x1xf32> to vector<2x128xf32>
    %44 = arith.divf %40, %43 : vector<2x128xf32>
    %c0_32 = arith.constant 0 : index
    %c0_33 = arith.constant 0 : index
    %45 = vector.load %arg12[%c0_32, %c0_33] : memref<2x128xf32, #tpu.memory_space<vmem>>, vector<2x128xf32>
    tpu.vector_store %arg12[%c0_32, %c0_33], %44 {strides = array<i32>} : memref<2x128xf32, #tpu.memory_space<vmem>>, vector<2x128xf32>,
    return
  }
}

</mosaic_0001>

<bundles_post_ra>
// kernel: encoder_forward.2
= control target key start
LH: loop header
LB: loop body
LE: loop exit
PB: predicated region body
PF: predicated region fallthrough
CT: control target
= control target key end

     0   :  { %vm224_vm0 = vcmask 1044480   ;;  %vm225_vm1 = vcmask 1045504   ;;  %vm169_vm2 = vcmask 220160   ;;  %v601_v1 = vmov 65535   ;;  %s784_s1 = inlined_call_operand.vmem [shape: bf16[27,64], index: 1, kind: input, shape index: {}]   ;;  %s785_s0 = inlined_call_operand.vmem [shape: bf16[288,27], index: 0, kind: input, shape index: {}]   ;;  %s786_s2 = inlined_call_operand.vmem [shape: f32[1,64], index: 2, kind: input, shape index: {}]   ;;  %s787_s3 = inlined_call_operand.vmem [shape: f32[1,64], index: 3, kind: input, shape index: {}]   ;;  %s788_s4 = inlined_call_operand.vmem [shape: f32[1,64], index: 4, kind: input, shape index: {}]   ;;  %s789_s5 = inlined_call_operand.vmem [shape: f32[32,64], index: 5, kind: output, shape index: {}]  }
   0x1   :  { %v581_v0 = vld [vmem:[%s784_s1] sm:$0xff]   ;;  %v226_v2 = vsel %vm224_vm0, 4294967295, %v601_v1  ;;  %v582_v3 = vld [vmem:[%s784_s1 + $0x8] sm:$0x3f]   ;;  %v585_v8 = vld [vmem:[%s785_s0 + $0x10] sm:$0xff]   ;;  %vm466_vm3 = vcmask 523264  }
   0x2   :  { %536 = vmatprep.subr.bf16.mxu0 %v581_v0  ;;  %v227_v4 = vsel %vm225_vm1, %v226_v2, 0  ;;  %v583_v5 = vld [vmem:[%s785_s0] sm:$0xff]   ;;  %576 = vmatprep.subr.bf16.mxu1 %v581_v0  ;;  %v584_v7 = vld [vmem:[%s785_s0 + $0x8] sm:$0xff]   ;;  %v587_v9 = vld [vmem:[%s785_s0 + $0x50] sm:$0xff]  }
   0x3   :  { %537 = vmatpush3.bf16.msra.mxu0 %v581_v0  ;;  %v229_v6 = vand.u32 %v582_v3, %v227_v4  ;;  %578 = vmatpush3.bf16.msra.mxu1 %v581_v0  ;;  %v588_v10 = vld [vmem:[%s785_s0 + $0x58] sm:$0xff]   ;;  %v591_v11 = vld [vmem:[%s785_s0 + $0x60] sm:$0xff]   ;;  %v592_v14 = vld [vmem:[%s785_s0 + $0x68] sm:$0xff]  }
   0x4   :  { %540 = vmatprep.mubr.msk.bf16.mxu0 %vm169_vm2, %v583_v5  ;;  %560 = vmatprep.mubr.msk.bf16.mxu1 %vm169_vm2, %v587_v9  ;;  %v586_v12 = vld [vmem:[%s785_s0 + $0x18] sm:$0xff]   ;;  %v589_v13 = vld [vmem:[%s785_s0 + $0x20] sm:$0xff]   ;;  %v595_v15 = vld [vmem:[%s785_s0 + $0x70] sm:$0xff]  }
   0x5   :  { %538 = vmatprep.subr.bf16.mxu0 %v229_v6  ;;  %577 = vmatprep.subr.bf16.mxu1 %v229_v6  ;;  %v590_v16 = vld [vmem:[%s785_s0 + $0x28] sm:$0xff]   ;;  %v596_v17 = vld [vmem:[%s785_s0 + $0x78] sm:$0xff]   ;;  %v593_v18 = vld [vmem:[%s785_s0 + $0x30] sm:$0xff]  }
   0x6   :  { %v599_v19 = vld [vmem:[%s785_s0 + $0x80] sm:$0xff]   ;;  %v594_v20 = vld [vmem:[%s785_s0 + $0x38] sm:$0xff]   ;;  %v600_v21 = vld [vmem:[%s785_s0 + $0x88] sm:$0xff]  }
   0x7   :  { %539 = vmatpush3.bf16.msra.mxu0 %v229_v6  ;;  %579 = vmatpush3.bf16.msra.mxu1 %v229_v6  ;;  %v597_v22 = vld [vmem:[%s785_s0 + $0x40] sm:$0xff]   ;;  %v598_v23 = vld [vmem:[%s785_s0 + $0x48] sm:$0xff]  }
   0x8   :  { %v721_v32 = vld [vmem:[%s786_s2] ss:$0 sm:$0xff] }
   0xa   :  { %541 = vmatmul.mubr.msk.bf16.vlgmr.msra.gmra.mrb[0].mxu0 %vm169_vm2, %v584_v7  ;;  %561 = vmatmul.mubr.msk.bf16.vlgmr.msra.gmra.mrb[0].mxu1 %vm169_vm2, %v588_v10 }
   0xb   :  { %544 = vmatprep.mubr.msk.bf16.mxu0 %vm169_vm2, %v585_v8  ;;  %564 = vmatprep.mubr.msk.bf16.mxu1 %vm169_vm2, %v591_v11 }
  0x12   :  { %545 = vmatmul.mubr.msk.bf16.gmra.mrb[4].mxu0 %vm169_vm2, %v586_v12  ;;  %565 = vmatmul.mubr.msk.bf16.gmra.mrb[4].mxu1 %vm169_vm2, %v592_v14 }
  0x13   :  { %548 = vmatprep.mubr.msk.bf16.mxu0 %vm169_vm2, %v589_v13  ;;  %568 = vmatprep.mubr.msk.bf16.mxu1 %vm169_vm2, %v595_v15 }
  0x1a   :  { %549 = vmatmul.mubr.msk.bf16.gmra.mrb[8].mxu0 %vm169_vm2, %v590_v16  ;;  %569 = vmatmul.mubr.msk.bf16.gmra.mrb[8].mxu1 %vm169_vm2, %v596_v17 }
  0x1b   :  { %552 = vmatprep.mubr.msk.bf16.mxu0 %vm169_vm2, %v593_v18  ;;  %572 = vmatprep.mubr.msk.bf16.mxu1 %vm169_vm2, %v599_v19 }
  0x22   :  { %553 = vmatmul.mubr.msk.bf16.gmra.mrb[12].mxu0 %vm169_vm2, %v594_v20  ;;  %573 = vmatmul.mubr.msk.bf16.gmra.mrb[12].mxu1 %vm169_vm2, %v600_v21 }
  0x23   :  { %556 = vmatprep.mubr.msk.bf16.mxu0 %vm169_vm2, %v597_v22 }
  0x2a   :  { %557 = vmatmul.mubr.msk.bf16.gmra.mrb[16].mxu0 %vm169_vm2, %v598_v23 }
  0xdd   :  { %v542_v24 = vpop.f32.mrb[0].mxu0  ;;  %v710_v25 = vpop.f32.mrb[0].mxu1 }
  0xde   :  { %v265_v26 = vpop.f32.mrb[1].mxu0  ;;  %v712_v27 = vpop.f32.mrb[1].mxu1  ;;  %v274_v35 = vadd.f32 %v542_v24, %v721_v32 }
  0xdf   :  { %v543_v28 = vpop.f32.mrb[2].mxu0  ;;  %v714_v29 = vpop.f32.mrb[2].mxu1  ;;  %v266_v39 = vadd.f32 %v721_v32, %v265_v26 }
  0xe0   :  { %v268_v30 = vpop.f32.mrb[3].mxu0  ;;  %v716_v31 = vpop.f32.mrb[3].mxu1  ;;  %v277_v43 = vadd.f32 %v543_v28, %v721_v32  ;;  %v354_v28 = vadd.f32 %v710_v25, %v721_v32 }
  0xe1   :  { %v269_v48 = vadd.f32 %v721_v32, %v268_v30  ;;  %v346_v30 = vadd.f32 %v721_v32, %v712_v27 }
  0xe5   :  { %v546_v33 = vpop.f32.mrb[4].mxu0  ;;  %v723_v34 = vpop.f32.mrb[4].mxu1 }
  0xe6   :  { %v290_v36 = vadd.f32 %v546_v33, %v721_v32  ;;  %v281_v37 = vpop.f32.mrb[5].mxu0  ;;  %v361_v38 = vpop.f32.mrb[5].mxu1 }
  0xe7   :  { %v282_v40 = vadd.f32 %v721_v32, %v281_v37  ;;  %v547_v41 = vpop.f32.mrb[6].mxu0  ;;  %v567_v42 = vpop.f32.mrb[6].mxu1  ;;  %v357_v37 = vadd.f32 %v714_v29, %v721_v32  ;;  %v362_v25 = vadd.f32 %v721_v32, %v361_v38 }
  0xe8   :  { %v410_v44 = vmax.f32 %v274_v35, %v290_v36  ;;  %v293_v45 = vadd.f32 %v547_v41, %v721_v32  ;;  %v284_v46 = vpop.f32.mrb[7].mxu0  ;;  %v364_v47 = vpop.f32.mrb[7].mxu1 }
  0xe9   :  { %v408_v49 = vmax.f32 %v266_v39, %v282_v40  ;;  %v285_v50 = vadd.f32 %v721_v32, %v284_v46  ;;  %v349_v39 = vadd.f32 %v721_v32, %v716_v31  ;;  %v365_v46 = vadd.f32 %v721_v32, %v364_v47 }
  0xea   :  { %v411_v51 = vmax.f32 %v277_v43, %v293_v45  ;;  %v370_v43 = vadd.f32 %v723_v34, %v721_v32  ;;  %v373_v45 = vadd.f32 %v567_v42, %v721_v32 }
  0xeb   :  { %v409_v52 = vmax.f32 %v269_v48, %v285_v50 }
  0xed   :  { %v550_v53 = vpop.f32.mrb[8].mxu0  ;;  %v570_v54 = vpop.f32.mrb[8].mxu1 }
  0xee   :  { %v306_v55 = vadd.f32 %v550_v53, %v721_v32  ;;  %v297_v56 = vpop.f32.mrb[9].mxu0  ;;  %v377_v57 = vpop.f32.mrb[9].mxu1  ;;  %v386_v29 = vadd.f32 %v570_v54, %v721_v32  ;;  %v514_v54 = vld [vmem:[%s787_s3] ss:$0 sm:$0xff] }
  0xef   :  { %v298_v58 = vadd.f32 %v721_v32, %v297_v56  ;;  %v551_v59 = vpop.f32.mrb[10].mxu0  ;;  %v571_v60 = vpop.f32.mrb[10].mxu1 }
  0xf0   :  { %v414_v61 = vmax.f32 %v410_v44, %v306_v55  ;;  %v309_v62 = vadd.f32 %v551_v59, %v721_v32  ;;  %v300_v63 = vpop.f32.mrb[11].mxu0  ;;  %v380_v0 = vpop.f32.mrb[11].mxu1  ;;  %v389_v55 = vadd.f32 %v571_v60, %v721_v32 }
  0xf1   :  { %v412_v1 = vmax.f32 %v408_v49, %v298_v58  ;;  %v301_v2 = vadd.f32 %v721_v32, %v300_v63  ;;  %v381_v47 = vadd.f32 %v721_v32, %v380_v0  ;;  %v515_v63 = vld [vmem:[%s788_s4] ss:$0 sm:$0xff] }
  0xf2   :  { %v415_v3 = vmax.f32 %v411_v51, %v309_v62 }
  0xf3   :  { %v413_v4 = vmax.f32 %v409_v52, %v301_v2  ;;  %v378_v52 = vadd.f32 %v721_v32, %v377_v57 }
  0xf5   :  { %v554_v5 = vpop.f32.mrb[12].mxu0  ;;  %v574_v6 = vpop.f32.mrb[12].mxu1 }
  0xf6   :  { %v322_v7 = vadd.f32 %v554_v5, %v721_v32  ;;  %v313_v8 = vpop.f32.mrb[13].mxu0  ;;  %v393_v9 = vpop.f32.mrb[13].mxu1  ;;  %v402_v31 = vadd.f32 %v574_v6, %v721_v32 }
  0xf7   :  { %v314_v10 = vadd.f32 %v721_v32, %v313_v8  ;;  %v555_v11 = vpop.f32.mrb[14].mxu0  ;;  %v575_v12 = vpop.f32.mrb[14].mxu1  ;;  %v394_v34 = vadd.f32 %v721_v32, %v393_v9 }
  0xf8   :  { %v418_v13 = vmax.f32 %v414_v61, %v322_v7  ;;  %v325_v14 = vadd.f32 %v555_v11, %v721_v32  ;;  %v316_v15 = vpop.f32.mrb[15].mxu0  ;;  %v396_v16 = vpop.f32.mrb[15].mxu1  ;;  %v405_v62 = vadd.f32 %v575_v12, %v721_v32 }
  0xf9   :  { %v416_v17 = vmax.f32 %v412_v1, %v314_v10  ;;  %v317_v18 = vadd.f32 %v721_v32, %v316_v15  ;;  %v397_v60 = vadd.f32 %v721_v32, %v396_v16 }
  0xfa   :  { %v419_v19 = vmax.f32 %v415_v3, %v325_v14 }
  0xfb   :  { %v417_v20 = vmax.f32 %v413_v4, %v317_v18 }
  0xfd   :  { %v558_v21 = vpop.f32.mrb[16].mxu0 }
  0xfe   :  { %v338_v22 = vadd.f32 %v558_v21, %v721_v32  ;;  %v329_v23 = vpop.f32.mrb[17].mxu0 }
  0xff   :  { %v330_v24 = vadd.f32 %v721_v32, %v329_v23  ;;  %v559_v26 = vpop.f32.mrb[18].mxu0 }
 0x100   :  { %v422_v33 = vmax.f32 %v418_v13, %v338_v22  ;;  %v341_v35 = vadd.f32 %v559_v26, %v721_v32  ;;  %v332_v36 = vpop.f32.mrb[19].mxu0 }
 0x101   :  { %v420_v40 = vmax.f32 %v416_v17, %v330_v24  ;;  %v333_v41 = vadd.f32 %v721_v32, %v332_v36 }
 0x102   :  { %v426_v44 = vmax.f32 %v422_v33, %v354_v28  ;;  %v423_v27 = vmax.f32 %v419_v19, %v341_v35 }
 0x103   :  { %v424_v48 = vmax.f32 %v420_v40, %v346_v30  ;;  %v421_v49 = vmax.f32 %v417_v20, %v333_v41 }
 0x104   :  { %v427_v50 = vmax.f32 %v423_v27, %v357_v37  ;;  %v430_v51 = vmax.f32 %v426_v44, %v370_v43 }
 0x105   :  { %v425_v53 = vmax.f32 %v421_v49, %v349_v39  ;;  %v428_v38 = vmax.f32 %v424_v48, %v362_v25 }
 0x106   :  { %v434_v56 = vmax.f32 %v430_v51, %v386_v29  ;;  %v431_v42 = vmax.f32 %v427_v50, %v373_v45 }
 0x107   :  { %v432_v58 = vmax.f32 %v428_v38, %v378_v52  ;;  %v429_v59 = vmax.f32 %v425_v53, %v365_v46 }
 0x108   :  { %v438_v61 = vmax.f32 %v434_v56, %v402_v31  ;;  %v435_v57 = vmax.f32 %v431_v42, %v389_v55 }
 0x109   :  { %v436_v1 = vmax.f32 %v432_v58, %v394_v34  ;;  %v433_v2 = vmax.f32 %v429_v59, %v381_v47 }
 0x10a   :  { %v449_v3 = vmul.f32 %v514_v54, %v438_v61  ;;  %v439_v0 = vmax.f32 %v435_v57, %v405_v62 }
 0x10b   :  { %v447_v4 = vmul.f32 %v514_v54, %v436_v1  ;;  %v437_v5 = vmax.f32 %v433_v2, %v397_v60 }
 0x10c   :  { %v460_v6 = vadd.f32 %v515_v63, %v449_v3  ;;  %v450_v7 = vmul.f32 %v514_v54, %v439_v0 }
 0x10d   :  { %v458_v8 = vadd.f32 %v515_v63, %v447_v4  ;;  %v448_v9 = vmul.f32 %v514_v54, %v437_v5 }
 0x10e   :  { %v464_v10 = vmax.f32 %v460_v6, 0.0  ;;  %v461_v11 = vadd.f32 %v515_v63, %v450_v7 }
 0x10f   :  { %v462_v12 = vmax.f32 %v458_v8, 0.0  ;;  %v459_v13 = vadd.f32 %v515_v63, %v448_v9 }
 0x110   :  { %469 = vst.msk [vmem:[%s789_s5 + $0x10] sm:$0xff] %vm466_vm3, %v464_v10  ;;  %v465_v14 = vmax.f32 %v461_v11, 0.0 }
 0x111   :  { %467 = vst.msk [vmem:[%s789_s5] sm:$0xff] %vm466_vm3, %v462_v12  ;;  %v463_v32 = vmax.f32 %v459_v13, 0.0 }
 0x112   :  { %470 = vst.msk [vmem:[%s789_s5 + $0x18] sm:$0xff] %vm466_vm3, %v465_v14 }
 0x113   :  { %468 = vst.msk [vmem:[%s789_s5 + $0x8] sm:$0xff] %vm466_vm3, %v463_v32 }

// kernel: encoder_forward.3
= control target key start
LH: loop header
LB: loop body
LE: loop exit
PB: predicated region body
PF: predicated region fallthrough
CT: control target
= control target key end

     0   :  { %18 = vsyncpa [#allocation3], 0  ;;  %v128_v29 = vlaneseq  ;;  %v1152_v32 = vmov 1966171168   ;;  %v1153_v36 = vmov 0.0   ;;  %s1445_s0 = inlined_call_operand.vmem [shape: bf16[2,576], index: 0, kind: input, shape index: {}]   ;;  %s1446_s1 = inlined_call_operand.vmem [shape: bf16[576,128], index: 1, kind: input, shape index: {}]   ;;  %s1447_s2 = inlined_call_operand.vmem [shape: f32[1,128], index: 2, kind: input, shape index: {}]   ;;  %s1448_s3 = inlined_call_operand.vmem [shape: bf16[128,32], index: 3, kind: input, shape index: {}]   ;;  %s1449_s4 = inlined_call_operand.vmem [shape: f32[1,32], index: 4, kind: input, shape index: {}]   ;;  %s1450_s5 = inlined_call_operand.vmem [shape: bf16[32,32], index: 5, kind: input, shape index: {}]   ;;  %s1451_s6 = inlined_call_operand.vmem [shape: f32[1,32], index: 6, kind: input, shape index: {}]   ;;  %s1452_s7 = inlined_call_operand.vmem [shape: bf16[32,128], index: 7, kind: input, shape index: {}]   ;;  %s1453_s8 = inlined_call_operand.vmem [shape: f32[1,128], index: 8, kind: input, shape index: {}]   ;;  %s1454_s9 = inlined_call_operand.vmem [shape: bf16[32,128], index: 9, kind: input, shape index: {}]   ;;  %s1455_s10 = inlined_call_operand.vmem [shape: f32[1,128], index: 10, kind: input, shape index: {}]   ;;  %s1456_s11 = inlined_call_operand.hbm [shape: f32[2,128], index: 11, kind: output, shape index: {0}]   ;;  %s1457_s12 = inlined_call_operand.hbm [shape: f32[2,128], index: 12, kind: output, shape index: {1}]  }
   0x1   :  { %v1049_v0 = vld [vmem:[%s1446_s1 + $0x40] sm:$0xff]   ;;  %v1053_v4 = vld [vmem:[%s1446_s1 + $0x48] sm:$0xff]   ;;  %v1057_v8 = vld [vmem:[%s1446_s1 + $0x50] sm:$0xff]   ;;  %v126_v33 = vunpack.c.l.s4 %v1152_v32 }
   0x2   :  { %v1050_v1 = vld [vmem:[%s1446_s1] sm:$0xff]   ;;  %921 = vmatprep.subr.bf16.mxu0 %v1049_v0  ;;  %v1054_v5 = vld [vmem:[%s1446_s1 + $0x8] sm:$0xff]   ;;  %v1058_v9 = vld [vmem:[%s1446_s1 + $0x10] sm:$0xff]   ;;  %v129_v34 = vshrl.u32 %v128_v29, 7 }
   0x3   :  { %v1051_v2 = vld [vmem:[%s1446_s1 + $0xc0] sm:$0xff]   ;;  %922 = vmatpush3.bf16.msra.mxu0 %v1050_v1  ;;  %v1055_v6 = vld [vmem:[%s1446_s1 + $0xc8] sm:$0xff]   ;;  %v1059_v10 = vld [vmem:[%s1446_s1 + $0xd0] sm:$0xff]   ;;  %v127_v37 = vunpack.c.0.s8 %v126_v33 }
   0x4   :  { %v1052_v3 = vld [vmem:[%s1446_s1 + $0x80] sm:$0xff]   ;;  %943 = vmatprep.subr.bf16.mxu1 %v1051_v2  ;;  %923 = vmatprep.subr.bf16.mxu0 %v1053_v4  ;;  %v1056_v7 = vld [vmem:[%s1446_s1 + $0x88] sm:$0xff]   ;;  %v1060_v11 = vld [vmem:[%s1446_s1 + $0x90] sm:$0xff]  }
   0x5   :  { %944 = vmatpush3.bf16.msra.mxu1 %v1052_v3  ;;  %v1061_v12 = vld [vmem:[%s1446_s1 + $0x58] sm:$0xff]   ;;  %v1065_v16 = vld [vmem:[%s1446_s1 + $0x60] sm:$0xff]   ;;  %v1069_v20 = vld [vmem:[%s1446_s1 + $0x68] sm:$0xff]   ;;  %v130_v39 = vsub.s32 %v127_v37, %v129_v34 }
   0x6   :  { %945 = vmatprep.subr.bf16.mxu1 %v1055_v6  ;;  %v1062_v13 = vld [vmem:[%s1446_s1 + $0x18] sm:$0xff]   ;;  %v1066_v17 = vld [vmem:[%s1446_s1 + $0x20] sm:$0xff]   ;;  %v1070_v21 = vld [vmem:[%s1446_s1 + $0x28] sm:$0xff]  }
   0x7   :  { %924 = vmatpush3.bf16.msra.mxu0 %v1054_v5  ;;  %v1063_v14 = vld [vmem:[%s1446_s1 + $0xd8] sm:$0xff]   ;;  %v1067_v18 = vld [vmem:[%s1446_s1 + $0xe0] sm:$0xff]   ;;  %v1071_v22 = vld [vmem:[%s1446_s1 + $0xe8] sm:$0xff]  }
   0x8   :  { %925 = vmatprep.subr.bf16.mxu0 %v1057_v8  ;;  %v1064_v15 = vld [vmem:[%s1446_s1 + $0x98] sm:$0xff]   ;;  %v1068_v19 = vld [vmem:[%s1446_s1 + $0xa0] sm:$0xff]   ;;  %v1072_v23 = vld [vmem:[%s1446_s1 + $0xa8] sm:$0xff]  }
   0x9   :  { %946 = vmatpush3.bf16.msra.mxu1 %v1056_v7  ;;  %v1073_v24 = vld [vmem:[%s1446_s1 + $0x70] sm:$0xff]   ;;  %v1077_v28 = vld [vmem:[%s1446_s1 + $0x78] sm:$0xff]   ;;  %v43_v38 = vld [vmem:[%s1445_s0] sm:$0x1f] }
   0xa   :  { %947 = vmatprep.subr.bf16.mxu1 %v1059_v10  ;;  %v1074_v25 = vld [vmem:[%s1446_s1 + $0x30] sm:$0xff]   ;;  %v1078_v30 = vld [vmem:[%s1446_s1 + $0x38] sm:$0xff]   ;;  %v131_v40 = vrot.slane %v43_v38, %v130_v39  ;;  %v1082_v43 = vld [vmem:[%s1446_s1 + $0x100] sm:$0xff]  }
   0xb   :  { %926 = vmatpush3.bf16.msra.mxu0 %v1058_v9  ;;  %v1075_v26 = vld [vmem:[%s1446_s1 + $0xf0] sm:$0xff]   ;;  %v1079_v31 = vld [vmem:[%s1446_s1 + $0xf8] sm:$0xff]   ;;  %v1086_v45 = vld [vmem:[%s1448_s3] sm:$0xff]  }
   0xc   :  { %927 = vmatprep.subr.bf16.mxu0 %v1061_v12  ;;  %v1076_v27 = vld [vmem:[%s1446_s1 + $0xb0] sm:$0xff]   ;;  %v1081_v35 = vld [vmem:[%s1446_s1 + $0xb8] sm:$0xff]   ;;  %v139_v41 = vcombine.high %v131_v40, %v131_v40  ;;  %v146_v42 = vrot.slane %v131_v40, %v130_v39  ;;  %v1083_v48 = vld [vmem:[%s1446_s1 + $0x108] sm:$0xff]  }
   0xd   :  { %948 = vmatpush3.bf16.msra.mxu1 %v1060_v11 }
   0xe   :  { %949 = vmatprep.subr.bf16.mxu1 %v1063_v14  ;;  %v160_v44 = vrot.slane %v139_v41, %v130_v39  ;;  %v161_v46 = vcombine.high %v146_v42, %v146_v42 }
   0xf   :  { %928 = vmatpush3.bf16.msra.mxu0 %v1062_v13 }
  0x10   :  { %929 = vmatprep.subr.bf16.mxu0 %v1065_v16  ;;  %419 = vmatprep.mubr.bf16.mxu0 %v160_v44  ;;  %v162_v47 = vcombine.high %v160_v44, %v160_v44 }
  0x11   :  { %950 = vmatpush3.bf16.msra.mxu1 %v1064_v15 }
  0x12   :  { %951 = vmatprep.subr.bf16.mxu1 %v1067_v18  ;;  %459 = vmatprep.mubr.bf16.mxu1 %v162_v47 }
  0x13   :  { %930 = vmatpush3.bf16.msra.mxu0 %v1066_v17 }
  0x14   :  { %931 = vmatprep.subr.bf16.mxu0 %v1069_v20 }
  0x15   :  { %952 = vmatpush3.bf16.msra.mxu1 %v1068_v19 }
  0x16   :  { %953 = vmatprep.subr.bf16.mxu1 %v1071_v22 }
  0x17   :  { %932 = vmatpush3.bf16.msra.mxu0 %v1070_v21 }
  0x18   :  { %933 = vmatprep.subr.bf16.mxu0 %v1073_v24 }
  0x19   :  { %954 = vmatpush3.bf16.msra.mxu1 %v1072_v23 }
  0x1a   :  { %955 = vmatprep.subr.bf16.mxu1 %v1075_v26 }
  0x1b   :  { %934 = vmatpush3.bf16.msra.mxu0 %v1074_v25 }
  0x1c   :  { %935 = vmatprep.subr.bf16.mxu0 %v1077_v28 }
  0x1d   :  { %956 = vmatpush3.bf16.msra.mxu1 %v1076_v27 }
  0x1e   :  { %957 = vmatprep.subr.bf16.mxu1 %v1079_v31 }
  0x1f   :  { %936 = vmatpush3.bf16.msra.mxu0 %v1078_v30 }
  0x20   :  { %988 = vmatprep.subr.bf16.mxu0 %v1153_v36 }
  0x21   :  { %958 = vmatpush3.bf16.msra.mxu1 %v1081_v35 }
  0x22   :  { %1000 = vmatprep.subr.bf16.mxu1 %v1153_v36  ;;  %420 = vmatmul.mubr.bf16.vlgmr.msra.gmra.mrb[0].mxu0 %v146_v42 }
  0x23   :  { %989 = vmatpush3.bf16.msra.mxu0 %v1082_v43 }
  0x24   :  { %19 = vsyncpa [#allocation5], 0  ;;  %460 = vmatmul.mubr.bf16.vlgmr.msra.gmra.mrb[0].mxu1 %v161_v46  ;;  %990 = vmatprep.subr.bf16.mxu0 %v1153_v36  ;;  %vm1154_vm0 = vmmov 0   ;;  %v1087_v49 = vld [vmem:[%s1448_s3 + $0x8] sm:$0xff]   ;;  %v124_v50 = vcombine.high %v43_v38, %v43_v38  ;;  %v1084_v51 = vld [vmem:[%s1446_s1 + $0x110] sm:$0xff]   ;;  %vm383_vm1 = vcmask 523264  }
  0x25   :  { %996 = vmatprep.mubr.msk.bf16.mxu0 %vm1154_vm0, %v1153_v36  ;;  %1001 = vmatpush3.bf16.msra.mxu1 %v1086_v45  ;;  %v1085_v53 = vld [vmem:[%s1446_s1 + $0x118] sm:$0xff]   ;;  %v1088_v55 = vld [vmem:[%s1448_s3 + $0x10] sm:$0xff]   ;;  %v1090_v57 = vld [vmem:[%s1448_s3 + $0x20] sm:$0xff]   ;;  %vm645_vm2 = vcmask 261120   ;;  %vm821_vm3 = vcmask 1041408  }
  0x26   :  { %1002 = vmatprep.subr.bf16.mxu1 %v1153_v36  ;;  %1016 = vmatprep.mubr.msk.bf16.mxu1 %vm1154_vm0, %v1153_v36  ;;  %v138_v52 = vrot.slane %v124_v50, %v130_v39  ;;  %v1089_v56 = vld [vmem:[%s1448_s3 + $0x18] sm:$0xff]   ;;  %v1091_v58 = vld [vmem:[%s1448_s3 + $0x28] sm:$0xff]   ;;  %v1092_v59 = vld [vmem:[%s1448_s3 + $0x30] sm:$0xff]  }
  0x27   :  { %991 = vmatpush3.bf16.msra.mxu0 %v1083_v48  ;;  %v1093_v60 = vld [vmem:[%s1448_s3 + $0x38] sm:$0xff]   ;;  %v1094_v61 = vld [vmem:[%s1450_s5] sm:$0xff]   ;;  %v1095_v18 = vld [vmem:[%s1450_s5 + $0x8] sm:$0xff]  }
  0x28   :  { %992 = vmatprep.subr.bf16.mxu0 %v1153_v36  ;;  %v153_v54 = vrot.slane %v138_v52, %v130_v39  ;;  %v862_v63 = vld [vmem:[%s1447_s2] ss:$0 sm:$0xff]  ;;  %v1097_v28 = vld [vmem:[%s1452_s7 + $0x8] sm:$0xff]  }
  0x29   :  { %1003 = vmatpush3.bf16.msra.mxu1 %v1087_v49  ;;  %v900_v19 = vld [vmem:[%s1449_s4] ss:$0 sm:$0xff]  ;;  %v1099_v39 = vld [vmem:[%s1454_s9 + $0x8] sm:$0xff]  }
  0x2a   :  { %1004 = vmatprep.subr.bf16.mxu1 %v1153_v36  ;;  %v1096_v26 = vld [vmem:[%s1452_s7] sm:$0xff]  }
  0x2b   :  { %993 = vmatpush3.bf16.msra.mxu0 %v1084_v51  ;;  %v909_v29 = vld [vmem:[%s1451_s6] ss:$0 sm:$0xff] }
  0x2c   :  { %994 = vmatprep.subr.bf16.mxu0 %v1153_v36  ;;  %v1098_v37 = vld [vmem:[%s1454_s9] sm:$0xff]  }
  0x2d   :  { %1005 = vmatpush3.bf16.msra.mxu1 %v1088_v55  ;;  %v913_v40 = vld [vmem:[%s1453_s8] ss:$0 sm:$0xff]  ;;  %s1155_s8 = smov [#allocation2]  }
  0x2e   :  { %1006 = vmatprep.subr.bf16.mxu1 %v1153_v36  ;;  %v917_v46 = vld [vmem:[%s1455_s10] ss:$0 sm:$0xff]  ;;  %s840_s14 = sshll.u32 %s1155_s8, 4  ;;  %s841_s14 = int_to_ptr.vmem [resolvable:$true] %s840_s14 }
  0x2f   :  { %995 = vmatpush3.bf16.msra.mxu0 %v1085_v53  ;;  %s1104_s15 = scalar_lea.vmem %s841_s14, 32  ;;  %p1109_p1 = scmp.lt.s32.totalorder %s841_s14, %s841_s14 }
  0x30   :  { %1020 = vmatprep.subr.bf16.mxu0 %v1153_v36  ;;  %p1105_p0 = scmp.ne.s32.totalorder %s841_s14, %s1104_s15  ;;  %p1110_p2 = scmp.lt.s32.totalorder %s1104_s15, %s1104_s15 }
  0x31   :  { %1007 = vmatpush3.bf16.msra.mxu1 %v1089_v56 }
  0x32   :  { %997 = vmatmul.mubr.msk.bf16.vlgmr.msra.gmra.mrb[4].mxu0 %vm383_vm1, %v153_v54  ;;  %1008 = vmatprep.subr.bf16.mxu1 %v1153_v36  ;;  %p1111_p3 = por %p1110_p2, %p1109_p1 }
  0x33   :  { %1024 = vmatprep.mubr.msk.bf16.mxu0 %vm1154_vm0, %v1153_v36  ;;  %1021 = vmatpush3.bf16.msra.mxu0 %v1094_v61 }
  0x34   :  { %1022 = vmatprep.subr.bf16.mxu0 %v1153_v36  ;;  %p1112_p4 = pnand %p1111_p3, %p1105_p0 }
  0x35   :  { %1009 = vmatpush3.bf16.msra.mxu1 %v1090_v57 }
  0x36   :  { %1010 = vmatprep.subr.bf16.mxu1 %v1153_v36 }
  0x37   :  { %1023 = vmatpush3.bf16.msra.mxu0 %v1095_v18 }
  0x38   :  { %1028 = vmatprep.subr.bf16.mxu0 %v1153_v36 }
  0x39   :  { %1011 = vmatpush3.bf16.msra.mxu1 %v1091_v58 }
  0x3a   :  { %1012 = vmatprep.subr.bf16.mxu1 %v1153_v36 }
  0x3d   :  { %1013 = vmatpush3.bf16.msra.mxu1 %v1092_v59 }
  0x3e   :  { %1014 = vmatprep.subr.bf16.mxu1 %v1153_v36 }
  0x41   :  { %1015 = vmatpush3.bf16.msra.mxu1 %v1093_v60 }
  0xf5   :  { %v937_v62 = vpop.f32.mrb[0].mxu0 }
  0xf6   :  { %v938_v0 = vpop.f32.mrb[1].mxu0 }
  0xf7   :  { %v939_v1 = vadd.f32 %v938_v0, %v937_v62  ;;  %v940_v2 = vpop.f32.mrb[2].mxu0  ;;  %v959_v3 = vpop.f32.mrb[0].mxu1 }
  0xf8   :  { %v941_v4 = vpop.f32.mrb[3].mxu0  ;;  %v960_v5 = vpop.f32.mrb[1].mxu1 }
  0xf9   :  { %v422_v6 = vadd.f32 %v939_v1, %v862_v63  ;;  %v961_v7 = vadd.f32 %v960_v5, %v959_v3  ;;  %v962_v8 = vpop.f32.mrb[2].mxu1 }
  0xfa   :  { %v963_v9 = vpop.f32.mrb[3].mxu1 }
  0xfb   :  { %v462_v10 = vadd.f32 %v961_v7, %v422_v6 }
 0x105   :  { %v501_v11 = vpop.f32.mrb[4].mxu0 }
 0x106   :  { %v502_v12 = vadd.f32 %v501_v11, %v462_v10  ;;  %v998_v13 = vpop.f32.mrb[5].mxu0 }
 0x107   :  { %v504_v14 = vpop.f32.mrb[6].mxu0 }
 0x108   :  { %v507_v15 = vmax.f32 %v502_v12, 0.0  ;;  %v999_v16 = vpop.f32.mrb[7].mxu0 }
 0x10a   :  { %v508_v17 = vpack.c.bf16 %v507_v15, %v507_v15 }
 0x10c   :  { %1017 = vmatmul.mubr.bf16.vlgmr.msra.gmra.mrb[4].mxu1 %v508_v17 }
 0x1df   :  { %v614_v20 = vpop.f32.mrb[4].mxu1 }
 0x1e0   :  { %v615_v21 = vadd.f32 %v900_v19, %v614_v20  ;;  %v1018_v22 = vpop.f32.mrb[5].mxu1 }
 0x1e1   :  { %v617_v23 = vpop.f32.mrb[6].mxu1 }
 0x1e2   :  { %v620_v24 = vmax.f32 %v615_v21, 0.0  ;;  %v1019_v25 = vpop.f32.mrb[7].mxu1 }
 0x1e4   :  { %v621_v27 = vpack.c.bf16 %v620_v24, %v620_v24 }
 0x1e6   :  { %1025 = vmatmul.mubr.msk.bf16.vlgmr.msra.gmra.mrb[8].mxu0 %vm645_vm2, %v621_v27 }
 0x1e7   :  { %1029 = vmatpush3.bf16.msra.mxu0 %v1096_v26  ;;  %1032 = vmatprep.mubr.msk.bf16.mxu0 %vm1154_vm0, %v1153_v36 }
 0x1e8   :  { %1030 = vmatprep.subr.bf16.mxu0 %v1153_v36 }
 0x1eb   :  { %1031 = vmatpush3.bf16.msra.mxu0 %v1097_v28 }
 0x1ec   :  { %1036 = vmatprep.subr.bf16.mxu0 %v1153_v36 }
 0x2b9   :  { %v683_v30 = vpop.f32.mrb[8].mxu0 }
 0x2ba   :  { %v684_v31 = vadd.f32 %v909_v29, %v683_v30  ;;  %v1026_v32 = vpop.f32.mrb[9].mxu0 }
 0x2bb   :  { %v686_v33 = vpop.f32.mrb[10].mxu0 }
 0x2bc   :  { %v689_v34 = vmax.f32 %v684_v31, 0.0  ;;  %v1027_v35 = vpop.f32.mrb[11].mxu0 }
 0x2be   :  { %v690_v38 = vpack.c.bf16 %v689_v34, %v689_v34 }
 0x2c0   :  { %1033 = vmatmul.mubr.msk.bf16.vlgmr.msra.gmra.mrb[12].mxu0 %vm645_vm2, %v690_v38 }
 0x2c1   :  { %1037 = vmatpush3.bf16.msra.mxu0 %v1098_v37  ;;  %1040 = vmatprep.mubr.msk.bf16.mxu0 %vm1154_vm0, %v1153_v36 }
 0x2c2   :  { %1038 = vmatprep.subr.bf16.mxu0 %v1153_v36 }
 0x2c5   :  { %1039 = vmatpush3.bf16.msra.mxu0 %v1099_v39 }
 0x2c8   :  { %1041 = vmatmul.mubr.msk.bf16.vlgmr.msra.gmra.mrb[16].mxu0 %vm645_vm2, %v690_v38 }
 0x393   :  { %v751_v41 = vpop.f32.mrb[12].mxu0 }
 0x394   :  { %v752_v42 = vadd.f32 %v913_v40, %v751_v41  ;;  %v1034_v43 = vpop.f32.mrb[13].mxu0 }
 0x395   :  { %v754_v44 = vpop.f32.mrb[14].mxu0 }
 0x396   :  { %757 = vst [vmem:[#allocation2] sm:$0x3] %v752_v42  ;;  %v1035_v45 = vpop.f32.mrb[15].mxu0 }
 0x39b   :  { %v815_v47 = vpop.f32.mrb[16].mxu0 }
 0x39c   :  { %v816_v36 = vadd.f32 %v917_v46, %v815_v47  ;;  %v1042_v48 = vpop.f32.mrb[17].mxu0 }
 0x39d   :  { %v818_v49 = vpop.f32.mrb[18].mxu0 }
 0x39e   :  { %v1043_v50 = vpop.f32.mrb[19].mxu0  ;;  %v822_v51 = vsel %vm821_vm3, %v816_v36, -inf }
 0x39f   :  { %823 = vmax.xlane.f32.xlu0 %v822_v51 }
 0x42c   :  { %v824_v52 = vpop.xlane.xlu0 %823 }
 0x42d   :  { %v825_v53 = vsub.f32 %v816_v36, %v824_v52 }
 0x42f   :  { %v826_v54 = vmul.f32 1.442695, %v825_v53 }
 0x431   :  { %1100 = vpow2.f32 %v826_v54 }
 0x43b   :  { %v1101_v55 = vpop.eup %1100 }
 0x43c   :  { %v828_v56 = vsel %vm821_vm3, %v1101_v55, 0.0 }
 0x43d   :  { %829 = vadd.xlane.f32.xlu0 %v828_v56 }
 0x43e   :  { %1115 = shalt.err (!%p1112_p4)
}
 0x43f   :  { %s1116_s17 = scalar_lea.hbm %s1456_s11, 32 }
 0x440   :  { %p1117_p5 = scmp.ne.s32.totalorder %s1456_s11, %s1116_s17  ;;  %p1120_p6 = scmp.lt.u32.totalorder %s1116_s17, %s1456_s11 }
 0x442   :  { %p1122_p7 = pnand %p1120_p6, %p1117_p5 }
 0x444   :  { %1125 = shalt.err (!%p1122_p7)
}
 0x445   :  { %843 = dma.vmem_to_hbm [thread:$0]  %s841_s14, 32, %s1456_s11, [#allocation3]  }
 0x446   :  { %s1156_s3 = smov [#allocation4]  }
 0x447   :  { %s850_s22 = sshll.u32 %s1156_s3, 4  ;;  %s851_s22 = int_to_ptr.vmem [resolvable:$true] %s850_s22 }
 0x448   :  { %s1126_s23 = scalar_lea.vmem %s851_s22, 32  ;;  %p1131_p9 = scmp.lt.s32.totalorder %s851_s22, %s851_s22 }
 0x449   :  { %p1127_p8 = scmp.ne.s32.totalorder %s851_s22, %s1126_s23  ;;  %p1132_p10 = scmp.lt.s32.totalorder %s1126_s23, %s1126_s23 }
 0x44b   :  { %p1133_p11 = por %p1132_p10, %p1131_p9 }
 0x44d   :  { %p1134_p12 = pnand %p1133_p11, %p1127_p8 }
 0x4ca   :  { %v830_v57 = vpop.xlane.xlu0 %829 }
 0x4cb   :  { %1102 = vrcp.f32 %v830_v57 }
 0x4d5   :  { %v1103_v58 = vpop.eup %1102 }
 0x4d6   :  { %v832_v59 = vmul.f32 %v1103_v58, %v1101_v55 }
 0x4d8   :  { %833 = vst [vmem:[#allocation4] sm:$0x3] %v832_v59 }
 0x4d9   :  { %1137 = shalt.err (!%p1134_p12)
}
 0x4da   :  { %s1138_s4 = scalar_lea.hbm %s1457_s12, 32 }
 0x4db   :  { %p1139_p13 = scmp.ne.s32.totalorder %s1457_s12, %s1138_s4  ;;  %p1142_p0 = scmp.lt.u32.totalorder %s1138_s4, %s1457_s12 }
 0x4dd   :  { %p1144_p1 = pnand %p1142_p0, %p1139_p13 }
 0x4df   :  { %1147 = shalt.err (!%p1144_p1)
}
 0x4e0   :  { %853 = dma.vmem_to_hbm [thread:$0]  %s851_s22, 32, %s1457_s12, [#allocation5]  }
 0x4e1   :  { %1148 = dma.done.wait [#allocation3], 32  }
 0x4e2   :  { %1149 = vsyncadd [#allocation3], 4294967264 }
 0x4e3   :  { %1150 = dma.done.wait [#allocation5], 32  }
 0x4e4   :  { %1151 = vsyncadd [#allocation5], 4294967264 }
 0x4e5   :  { %860 = vsyncpa [#allocation3], 1 }
 0x4e6   :  { %861 = vsyncpa [#allocation5], 1 }

</bundles_post_ra>
